<compile_context>
chip_gen: v5e
topology: v5e:2x2
jax: 0.10.0
libtpu: 0.0.40
codegen_flags: <defaults>
</compile_context>

<pallas_src>
import functools
import math

import jax
import jax.numpy as jnp
from jax.experimental import pallas as pl
from jax.experimental.pallas import tpu as pltpu

BN_EPS = 1e-5


# ============================================================================
# Fused Pallas kernel: stride-1 conv (in-kernel im2col) + bias + activation
# (+ optional residual skip).
# ============================================================================
def _fused_conv_kernel(x_ref, h_ref, w_ref, b_ref, *rest, kh, kw, act,
                       has_skip):
    if has_skip:
        s_ref, o_ref = rest
    else:
        (o_ref,) = rest
        s_ref = None

    tr = x_ref.shape[1]          # output rows handled by this grid step
    cin = x_ref.shape[3]
    wo = o_ref.shape[2]
    cout = o_ref.shape[3]

    # (tr + kh - 1, Wp, Cin) input window = main row band + halo rows.
    x_full = jnp.concatenate([x_ref[0], h_ref[0]], axis=0)

    acc = jnp.zeros((tr * wo, cout), jnp.float32)
    for dy in range(kh):
        for dx in range(kw):
            lhs = x_full[dy:dy + tr, dx:dx + wo, :].reshape(tr * wo, cin)
            acc = acc + jnp.dot(lhs, w_ref[dy * kw + dx],
                                preferred_element_type=jnp.float32)

    y = acc + b_ref[...]                      # (1, Cout) f32 broadcast
    if act == "relu":
        y = jnp.maximum(y, 0.0)
    elif act == "tanh":
        y = jnp.tanh(y)
    if has_skip:                              # fused ResnetBlock skip add
        y = y + s_ref[0].reshape(tr * wo, cout).astype(jnp.float32)
    o_ref[0] = y.reshape(tr, wo, cout).astype(o_ref.dtype)


def _pick_tr(ho, wp, cin, kh, max_tr):
    """Largest power-of-two divisor of `ho` (<= max_tr) whose main input block
    stays under a ~2 MiB VMEM budget (lane-padded bf16 estimate)."""
    budget = 2 << 20
    row_bytes = wp * max(cin, 128) * 2
    best, d = 1, 1
    while d <= min(ho, max_tr):
        if ho % d == 0 and (d == 1 or (d + kh - 1) * row_bytes <= budget):
            best = d
        d *= 2
    return best


def fused_conv(xp, prep, act="none", skip=None, out_dtype=jnp.bfloat16,
               max_tr=32):
    """Stride-1 conv over an already spatially padded NHWC input.

    xp   : (N, Hp, Wp, Cin) padded activation
    prep : {"w": (kh*kw, Cin, Cout) bf16, "b": (1, Cout) f32}
    out  : (N, Hp-kh+1, Wp-kw+1, Cout)
    """
    w, b = prep["w"], prep["b"]
    khkw, cin, cout = w.shape
    kh = kw = int(round(math.sqrt(khkw)))
    assert kh * kw == khkw
    n, hp, wp, cin_x = xp.shape
    assert cin_x == cin
    ho, wo = hp - kh + 1, wp - kw + 1
    # Epilogue applies the activation before the skip add; only valid as used.
    assert skip is None or act == "none"

    tr = _pick_tr(ho, wp, cin, kh, max_tr)
    nt = ho // tr
    assert nt * tr == ho

    xp = xp.astype(jnp.bfloat16)
    main = xp[:, :ho]                                      # (N, Ho, Wp, Cin)
    # Halo rows for tile i are padded rows [(i+1)*tr, (i+1)*tr + kh - 1).
    halo = jnp.stack([xp[:, tr + j::tr][:, :nt] for j in range(kh - 1)],
                     axis=2)                               # (N, nt, kh-1, Wp, Cin)
    halo = halo.reshape(n * nt, kh - 1, wp, cin)

    inputs = [main, halo, w, b]
    in_specs = [
        pl.BlockSpec((1, tr, wp, cin), lambda bi, ti: (bi, ti, 0, 0)),
        pl.BlockSpec((1, kh - 1, wp, cin),
                     lambda bi, ti, _nt=nt: (bi * _nt + ti, 0, 0, 0)),
        pl.BlockSpec((khkw, cin, cout), lambda bi, ti: (0, 0, 0)),
        pl.BlockSpec((1, cout), lambda bi, ti: (0, 0)),
    ]
    has_skip = skip is not None
    if has_skip:
        assert skip.shape == (n, ho, wo, cout)
        inputs.append(skip.astype(jnp.bfloat16))
        in_specs.append(pl.BlockSpec((1, tr, wo, cout),
                                     lambda bi, ti: (bi, ti, 0, 0)))

    return pl.pallas_call(
        functools.partial(_fused_conv_kernel, kh=kh, kw=kw, act=act,
                          has_skip=has_skip),
        out_shape=jax.ShapeDtypeStruct((n, ho, wo, cout), out_dtype),
        grid=(n, nt),
        in_specs=in_specs,
        out_specs=pl.BlockSpec((1, tr, wo, cout),
                               lambda bi, ti: (bi, ti, 0, 0)),
        compiler_params=pltpu.CompilerParams(
            dimension_semantics=("parallel", "parallel"),
            vmem_limit_bytes=40 * 1024 * 1024),
    )(*inputs)


# ============================================================================
# Plain-JAX glue: padding and space<->depth reorderings (1x HBM traffic each).
# ============================================================================
def _reflect_pad(x, p):
    return jnp.pad(x, ((0, 0), (p, p), (p, p), (0, 0)), mode="reflect")


def _zero_pad(x, p):
    return jnp.pad(x, ((0, 0), (p, p), (p, p), (0, 0)))


def _space_to_depth(x):
    n, h, w, c = x.shape
    x = x.reshape(n, h // 2, 2, w // 2, 2, c)
    x = jnp.transpose(x, (0, 1, 3, 2, 4, 5))
    return x.reshape(n, h // 2, w // 2, 4 * c)


def _depth_to_space(x):
    n, h, w, c4 = x.shape
    c = c4 // 4
    x = x.reshape(n, h, w, 2, 2, c)
    x = jnp.transpose(x, (0, 1, 3, 2, 4, 5))
    return x.reshape(n, 2 * h, 2 * w, c)


# ============================================================================
# One-time parameter preparation (hoisted out of the forward pass).
# ============================================================================
def _bn_scale_bias(gamma, beta):
    # TODO(synk): eval-mode BatchNorm with PyTorch-init running stats.
    scale = gamma / jnp.sqrt(1.0 + BN_EPS)
    return scale, beta


def _prep_conv(w_oihw, scale, bias):
    cout, cin, kh, kw = w_oihw.shape
    w = jnp.transpose(w_oihw, (2, 3, 1, 0)).reshape(kh * kw, cin, cout)
    w = (w * scale[None, None, :]).astype(jnp.bfloat16)
    return {"w": w, "b": bias.reshape(1, cout).astype(jnp.float32)}


def _prep_down(w_oihw, gamma, beta):
    """stride-2 3x3 conv == stride-1 2x2 conv on the space-to-depth input."""
    cout, cin, _, _ = w_oihw.shape
    scale, bias = _bn_scale_bias(gamma, beta)
    w = jnp.zeros((2, 2, 2, 2, cin, cout), jnp.float32)
    for a in range(2):
        for b in range(2):
            for p in range(2):
                for q in range(2):
                    ky, kx = 2 * a + p, 2 * b + q
                    if ky < 3 and kx < 3:
                        w = w.at[a, b, p, q].set(
                            jnp.transpose(w_oihw[:, :, ky, kx]))
    w = w.reshape(4, 4 * cin, cout)
    w = (w * scale[None, None, :]).astype(jnp.bfloat16)
    return {"w": w, "b": bias.reshape(1, cout).astype(jnp.float32)}


def _prep_up(w_iohw, gamma, beta):
    """ConvTranspose2d(k3,s2,p1,op1) == stride-1 2x2 conv emitting 4 parities."""
    cin, cout = w_iohw.shape[0], w_iohw.shape[1]
    scale, bias = _bn_scale_bias(gamma, beta)

    def tap(r, d):
        if r == 0:
            return 1 if d == 0 else None
        return 2 if d == 0 else 0

    w = jnp.zeros((2, 2, cin, 2, 2, cout), jnp.float32)
    for dy in range(2):
        for dx in range(2):
            for r in range(2):
                for s in range(2):
                    ky, kx = tap(r, dy), tap(s, dx)
                    if ky is not None and kx is not None:
                        w = w.at[dy, dx, :, r, s, :].set(w_iohw[:, :, ky, kx])
    w = w * scale[None, None, None, None, None, :]
    w = w.reshape(4, cin, 4 * cout).astype(jnp.bfloat16)
    b = jnp.tile(bias, 4).reshape(1, 4 * cout).astype(jnp.float32)
    return {"w": w, "b": b}


def prepare_params(params):
    """Fold BN, rearrange weights into GEMM-ready bf16 blocks (run once)."""
    p = params
    s, b = _bn_scale_bias(*p["bn1"])
    prepped = {
        "stem": _prep_conv(p["c1_w"], s, b),
        "down": [_prep_down(p["d1_w"], *p["bn_d1"]),
                 _prep_down(p["d2_w"], *p["bn_d2"])],
        "blocks": [],
        "up": [_prep_up(p["up1_w"], *p["bn_u1"]),
               _prep_up(p["up2_w"], *p["bn_u2"])],
    }
    for blk in p["blocks"]:
        s1, b1 = _bn_scale_bias(*blk["bn1"])
        s2, b2 = _bn_scale_bias(*blk["bn2"])
        prepped["blocks"].append({"c1": _prep_conv(blk["w1"], s1, b1),
                                  "c2": _prep_conv(blk["w2"], s2, b2)})
    ones = jnp.ones((p["out_w"].shape[0],), jnp.float32)
    prepped["final"] = _prep_conv(p["out_w"], ones, p["out_b"])
    return prepped


# ============================================================================
# ResnetGenerator forward
# ============================================================================
def resnet_generator_forward(prepped, x_nchw):
    x = jnp.transpose(x_nchw, (0, 2, 3, 1)).astype(jnp.bfloat16)   # NHWC bf16

    # ReflectionPad2d(3) + Conv7x7 + BN + ReLU
    x = fused_conv(_reflect_pad(x, 3), prepped["stem"], act="relu")

    # two downsampling Conv(3x3, s=2, p=1) + BN + ReLU (space-to-depth form)
    for dprep in prepped["down"]:
        x = fused_conv(_space_to_depth(_zero_pad(x, 1)), dprep, act="relu")

    # ResnetBlocks; the skip add is fused into the second conv's epilogue
    for blk in prepped["blocks"]:
        y = fused_conv(_reflect_pad(x, 1), blk["c1"], act="relu")
        x = fused_conv(_reflect_pad(y, 1), blk["c2"], act="none", skip=x)

    # two ConvTranspose2d(k3,s2,p1,op1) + BN + ReLU (sub-pixel form)
    for uprep in prepped["up"]:
        x4 = fused_conv(jnp.pad(x, ((0, 0), (0, 1), (0, 1), (0, 0))), uprep,
                        act="relu")
        # TODO(synk): depth-to-space interleave is a plain-JAX HBM shuffle; it
        # could be folded into the kernel's output BlockSpec.
        x = _depth_to_space(x4)

    # ReflectionPad2d(3) + Conv7x7 (+bias) + Tanh
    x = fused_conv(_reflect_pad(x, 3), prepped["final"], act="tanh",
                   out_dtype=jnp.float32)
    return jnp.transpose(x, (0, 3, 1, 2))                          # NCHW


# ============================================================================
# Pure-JAX reference (f32, HIGHEST precision) for validation.
# ============================================================================
def reference_forward(params, x_nchw):
    prec = jax.lax.Precision.HIGHEST

    def bn(x, gamma, beta):
        return x * (gamma / jnp.sqrt(1.0 + BN_EPS)) + beta

    def conv(x, w, stride=1):
        return jax.lax.conv_general_dilated(
            x, w, (stride, stride), "VALID",
            dimension_numbers=("NHWC", "OIHW", "NHWC"), precision=prec)

    def convT(x, w_iohw):
        w = jnp.transpose(w_iohw, (1, 0, 2, 3))[:, :, ::-1, ::-1]
        return jax.lax.conv_general_dilated(
            x, w, (1, 1), ((1, 2), (1, 2)), lhs_dilation=(2, 2),
            dimension_numbers=("NHWC", "OIHW", "NHWC"), precision=prec)

    p = params
    x = jnp.transpose(x_nchw, (0, 2, 3, 1)).astype(jnp.float32)
    x = jax.nn.relu(bn(conv(_reflect_pad(x, 3), p["c1_w"]), *p["bn1"]))
    x = jax.nn.relu(bn(conv(_zero_pad(x, 1), p["d1_w"], 2), *p["bn_d1"]))
    x = jax.nn.relu(bn(conv(_zero_pad(x, 1), p["d2_w"], 2), *p["bn_d2"]))
    for blk in p["blocks"]:
        y = jax.nn.relu(bn(conv(_reflect_pad(x, 1), blk["w1"]), *blk["bn1"]))
        y = bn(conv(_reflect_pad(y, 1), blk["w2"]), *blk["bn2"])
        x = x + y
    x = jax.nn.relu(bn(convT(x, p["up1_w"]), *p["bn_u1"]))
    x = jax.nn.relu(bn(convT(x, p["up2_w"]), *p["bn_u2"]))
    x = jnp.tanh(conv(_reflect_pad(x, 3), p["out_w"]) + p["out_b"])
    return jnp.transpose(x, (0, 3, 1, 2))


# ============================================================================
# Deterministic synthetic parameters (PyTorch weight shapes; BatchNorm layers
# have no conv bias, only the final 7x7 conv carries one).
# ============================================================================
def init_params(key, input_nc, output_nc, ngf, n_blocks):
    keys = iter(jax.random.split(key, 64))

    def conv_w(cout, cin, k, gain=1.0):
        std = gain * (2.0 / (cin * k * k)) ** 0.5
        return jax.random.normal(next(keys), (cout, cin, k, k),
                                 jnp.float32) * std

    def convT_w(cin, cout, k):
        std = (2.0 / (cin * k * k / 4.0)) ** 0.5
        return jax.random.normal(next(keys), (cin, cout, k, k),
                                 jnp.float32) * std

    def bn(c):
        gamma = 1.0 + 0.02 * jax.random.normal(next(keys), (c,), jnp.float32)
        beta = 0.02 * jax.random.normal(next(keys), (c,), jnp.float32)
        return (gamma, beta)

    d = ngf * 4
    blocks = [{"w1": conv_w(d, d, 3), "bn1": bn(d),
               "w2": conv_w(d, d, 3), "bn2": bn(d)} for _ in range(n_blocks)]
    return {
        "c1_w": conv_w(ngf, input_nc, 7), "bn1": bn(ngf),
        "d1_w": conv_w(ngf * 2, ngf, 3), "bn_d1": bn(ngf * 2),
        "d2_w": conv_w(ngf * 4, ngf * 2, 3), "bn_d2": bn(ngf * 4),
        "blocks": blocks,
        # ConvTranspose2d weights are (in_channels, out_channels, kH, kW)
        "up1_w": convT_w(ngf * 4, ngf * 2, 3), "bn_u1": bn(ngf * 2),
        "up2_w": convT_w(ngf * 2, ngf, 3), "bn_u2": bn(ngf),
        "out_w": conv_w(output_nc, ngf, 7, gain=0.3),
        "out_b": 0.02 * jax.random.normal(next(keys), (output_nc,),
                                          jnp.float32),
    }


# ============================================================================
if __name__ == "__main__":
    input_nc, output_nc, ngf, n_blocks = 3, 3, 8, 2
    B, H, W = 2, 16, 16

    key = jax.random.PRNGKey(0)
    kp, kx = jax.random.split(key)
    params = init_params(kp, input_nc, output_nc, ngf, n_blocks)
    x = jax.random.normal(kx, (B, input_nc, H, W), jnp.float32)

    # ---- unit check: multi-row-tile + halo path of the fused conv kernel ----
    ku1, ku2, ku3 = jax.random.split(jax.random.PRNGKey(1), 3)
    xu = jax.random.normal(ku1, (2, 14, 10, 16), jnp.float32)   # padded NHWC
    wu = jax.random.normal(ku2, (24, 16, 3, 3), jnp.float32) * 0.06
    bu = jax.random.normal(ku3, (24,), jnp.float32) * 0.1
    prep_u = _prep_conv(wu, jnp.ones((24,), jnp.float32), bu)
    got = jax.jit(functools.partial(fused_conv, act="relu",
                                    out_dtype=jnp.float32, max_tr=4))(
        xu.astype(jnp.bfloat16), prep_u)
    got = jax.block_until_ready(got)
    want = jax.nn.relu(
        jax.lax.conv_general_dilated(
            xu, wu, (1, 1), "VALID",
            dimension_numbers=("NHWC", "OIHW", "NHWC"),
            precision=jax.lax.Precision.HIGHEST) + bu)
    err_u = float(jnp.max(jnp.abs(got - want)))
    assert err_u < 6e-2, f"fused_conv unit check failed: max err {err_u}"

    # ---- end-to-end forward + pure-JAX reference ----
    prepped = prepare_params(params)
    fwd = jax.jit(resnet_generator_forward)
    out = jax.block_until_ready(fwd(prepped, x))

    assert out.shape == (B, output_nc, H, W), out.shape
    assert bool(jnp.all(jnp.isfinite(out)))
    assert bool(jnp.all(jnp.abs(out) <= 1.0 + 1e-6))        # tanh output range

    ref = reference_forward(params, x)
    max_err = float(jnp.max(jnp.abs(out - ref)))
    mean_err = float(jnp.mean(jnp.abs(out - ref)))
    assert max_err < 0.2 and mean_err < 0.03, (max_err, mean_err)
    print("KERNEL_OK")
</pallas_src>

<mosaic_0001>
module attributes {stable_mosaic.version = 11 : i64} {
  func.func @_fused_conv_kernel(%arg0: i32, %arg1: i32, %arg2: memref<1x4x10x16xbf16, #tpu.memory_space<vmem>>, %arg3: memref<1x2x10x16xbf16, #tpu.memory_space<vmem>>, %arg4: memref<9x16x24xbf16, #tpu.memory_space<vmem>>, %arg5: memref<1x24xf32, #tpu.memory_space<vmem>>, %arg6: memref<1x4x8x24xf32, #tpu.memory_space<vmem>>) attributes {dimension_semantics = [#tpu.dimension_semantics<parallel>, #tpu.dimension_semantics<parallel>], iteration_bounds = array<i64: 2, 3>, scalar_prefetch = 0 : i64, scratch_operands = 0 : i64, tpu.core_type = #tpu.core_type<tc>, window_params = [{transform_indices = @transform_0, window_bounds = array<i64: 1, 4, 10, 16>}, {transform_indices = @transform_1, window_bounds = array<i64: 1, 2, 10, 16>}, {pipeline_mode = #tpu.pipeline_mode<synchronous>, transform_indices = @transform_2, window_bounds = array<i64: 9, 16, 24>}, {pipeline_mode = #tpu.pipeline_mode<synchronous>, transform_indices = @transform_3, window_bounds = array<i64: 1, 24>}, {transform_indices = @transform_4, window_bounds = array<i64: 1, 4, 8, 24>}]} {
    %c0 = arith.constant 0 : index
    %c0_0 = arith.constant 0 : index
    %c0_1 = arith.constant 0 : index
    %c0_2 = arith.constant 0 : index
    %0 = vector.load %arg2[%c0, %c0_0, %c0_1, %c0_2] : memref<1x4x10x16xbf16, #tpu.memory_space<vmem>>, vector<1x4x10x16xbf16>
    %1 = vector.shape_cast %0 : vector<1x4x10x16xbf16> to vector<4x10x16xbf16>
    %c0_3 = arith.constant 0 : index
    %c0_4 = arith.constant 0 : index
    %c0_5 = arith.constant 0 : index
    %c0_6 = arith.constant 0 : index
    %2 = vector.load %arg3[%c0_3, %c0_4, %c0_5, %c0_6] : memref<1x2x10x16xbf16, #tpu.memory_space<vmem>>, vector<1x2x10x16xbf16>
    %3 = vector.shape_cast %2 : vector<1x2x10x16xbf16> to vector<2x10x16xbf16>
    %4 = tpu.concatenate %1, %3 in 0 : vector<4x10x16xbf16>, vector<2x10x16xbf16> -> vector<6x10x16xbf16>
    %cst = arith.constant 0.000000e+00 : f32
    %5 = vector.broadcast %cst : f32 to vector<32x24xf32>
    %6 = vector.extract_strided_slice %4 {offsets = [0, 0, 0], sizes = [4, 8, 16], strides = [1, 1, 1]} : vector<6x10x16xbf16> to vector<4x8x16xbf16>
    %7 = vector.shape_cast %6 : vector<4x8x16xbf16> to vector<32x16xbf16>
    %c0_7 = arith.constant 0 : index
    %c0_8 = arith.constant 0 : index
    %c0_9 = arith.constant 0 : index
    %8 = vector.load %arg4[%c0_7, %c0_8, %c0_9] : memref<9x16x24xbf16, #tpu.memory_space<vmem>>, vector<1x16x24xbf16>
    %9 = vector.shape_cast %8 : vector<1x16x24xbf16> to vector<16x24xbf16>
    %cst_10 = arith.constant dense<0.000000e+00> : vector<32x24xf32>
    %10 = tpu.matmul %7, %9, %cst_10 {dimension_numbers = #tpu.dot_dimension_numbers<[1], [0], [0], [1], [0, 0, 1, 1], [], []>} : vector<32x16xbf16>, vector<16x24xbf16>, vector<32x24xf32> -> vector<32x24xf32>
    %11 = arith.addf %5, %10 : vector<32x24xf32>
    %12 = vector.extract_strided_slice %4 {offsets = [0, 1, 0], sizes = [4, 8, 16], strides = [1, 1, 1]} : vector<6x10x16xbf16> to vector<4x8x16xbf16>
    %13 = vector.shape_cast %12 : vector<4x8x16xbf16> to vector<32x16xbf16>
    %c1 = arith.constant 1 : index
    %c0_11 = arith.constant 0 : index
    %c0_12 = arith.constant 0 : index
    %14 = vector.load %arg4[%c1, %c0_11, %c0_12] : memref<9x16x24xbf16, #tpu.memory_space<vmem>>, vector<1x16x24xbf16>
    %15 = vector.shape_cast %14 : vector<1x16x24xbf16> to vector<16x24xbf16>
    %cst_13 = arith.constant dense<0.000000e+00> : vector<32x24xf32>
    %16 = tpu.matmul %13, %15, %cst_13 {dimension_numbers = #tpu.dot_dimension_numbers<[1], [0], [0], [1], [0, 0, 1, 1], [], []>} : vector<32x16xbf16>, vector<16x24xbf16>, vector<32x24xf32> -> vector<32x24xf32>
    %17 = arith.addf %11, %16 : vector<32x24xf32>
    %18 = vector.extract_strided_slice %4 {offsets = [0, 2, 0], sizes = [4, 8, 16], strides = [1, 1, 1]} : vector<6x10x16xbf16> to vector<4x8x16xbf16>
    %19 = vector.shape_cast %18 : vector<4x8x16xbf16> to vector<32x16xbf16>
    %c2 = arith.constant 2 : index
    %c0_14 = arith.constant 0 : index
    %c0_15 = arith.constant 0 : index
    %20 = vector.load %arg4[%c2, %c0_14, %c0_15] : memref<9x16x24xbf16, #tpu.memory_space<vmem>>, vector<1x16x24xbf16>
    %21 = vector.shape_cast %20 : vector<1x16x24xbf16> to vector<16x24xbf16>
    %cst_16 = arith.constant dense<0.000000e+00> : vector<32x24xf32>
    %22 = tpu.matmul %19, %21, %cst_16 {dimension_numbers = #tpu.dot_dimension_numbers<[1], [0], [0], [1], [0, 0, 1, 1], [], []>} : vector<32x16xbf16>, vector<16x24xbf16>, vector<32x24xf32> -> vector<32x24xf32>
    %23 = arith.addf %17, %22 : vector<32x24xf32>
    %24 = vector.extract_strided_slice %4 {offsets = [1, 0, 0], sizes = [4, 8, 16], strides = [1, 1, 1]} : vector<6x10x16xbf16> to vector<4x8x16xbf16>
    %25 = vector.shape_cast %24 : vector<4x8x16xbf16> to vector<32x16xbf16>
    %c3 = arith.constant 3 : index
    %c0_17 = arith.constant 0 : index
    %c0_18 = arith.constant 0 : index
    %26 = vector.load %arg4[%c3, %c0_17, %c0_18] : memref<9x16x24xbf16, #tpu.memory_space<vmem>>, vector<1x16x24xbf16>
    %27 = vector.shape_cast %26 : vector<1x16x24xbf16> to vector<16x24xbf16>
    %cst_19 = arith.constant dense<0.000000e+00> : vector<32x24xf32>
    %28 = tpu.matmul %25, %27, %cst_19 {dimension_numbers = #tpu.dot_dimension_numbers<[1], [0], [0], [1], [0, 0, 1, 1], [], []>} : vector<32x16xbf16>, vector<16x24xbf16>, vector<32x24xf32> -> vector<32x24xf32>
    %29 = arith.addf %23, %28 : vector<32x24xf32>
    %30 = vector.extract_strided_slice %4 {offsets = [1, 1, 0], sizes = [4, 8, 16], strides = [1, 1, 1]} : vector<6x10x16xbf16> to vector<4x8x16xbf16>
    %31 = vector.shape_cast %30 : vector<4x8x16xbf16> to vector<32x16xbf16>
    %c4 = arith.constant 4 : index
    %c0_20 = arith.constant 0 : index
    %c0_21 = arith.constant 0 : index
    %32 = vector.load %arg4[%c4, %c0_20, %c0_21] : memref<9x16x24xbf16, #tpu.memory_space<vmem>>, vector<1x16x24xbf16>
    %33 = vector.shape_cast %32 : vector<1x16x24xbf16> to vector<16x24xbf16>
    %cst_22 = arith.constant dense<0.000000e+00> : vector<32x24xf32>
    %34 = tpu.matmul %31, %33, %cst_22 {dimension_numbers = #tpu.dot_dimension_numbers<[1], [0], [0], [1], [0, 0, 1, 1], [], []>} : vector<32x16xbf16>, vector<16x24xbf16>, vector<32x24xf32> -> vector<32x24xf32>
    %35 = arith.addf %29, %34 : vector<32x24xf32>
    %36 = vector.extract_strided_slice %4 {offsets = [1, 2, 0], sizes = [4, 8, 16], strides = [1, 1, 1]} : vector<6x10x16xbf16> to vector<4x8x16xbf16>
    %37 = vector.shape_cast %36 : vector<4x8x16xbf16> to vector<32x16xbf16>
    %c5 = arith.constant 5 : index
    %c0_23 = arith.constant 0 : index
    %c0_24 = arith.constant 0 : index
    %38 = vector.load %arg4[%c5, %c0_23, %c0_24] : memref<9x16x24xbf16, #tpu.memory_space<vmem>>, vector<1x16x24xbf16>
    %39 = vector.shape_cast %38 : vector<1x16x24xbf16> to vector<16x24xbf16>
    %cst_25 = arith.constant dense<0.000000e+00> : vector<32x24xf32>
    %40 = tpu.matmul %37, %39, %cst_25 {dimension_numbers = #tpu.dot_dimension_numbers<[1], [0], [0], [1], [0, 0, 1, 1], [], []>} : vector<32x16xbf16>, vector<16x24xbf16>, vector<32x24xf32> -> vector<32x24xf32>
    %41 = arith.addf %35, %40 : vector<32x24xf32>
    %42 = vector.extract_strided_slice %4 {offsets = [2, 0, 0], sizes = [4, 8, 16], strides = [1, 1, 1]} : vector<6x10x16xbf16> to vector<4x8x16xbf16>
    %43 = vector.shape_cast %42 : vector<4x8x16xbf16> to vector<32x16xbf16>
    %c6 = arith.constant 6 : index
    %c0_26 = arith.constant 0 : index
    %c0_27 = arith.constant 0 : index
    %44 = vector.load %arg4[%c6, %c0_26, %c0_27] : memref<9x16x24xbf16, #tpu.memory_space<vmem>>, vector<1x16x24xbf16>
    %45 = vector.shape_cast %44 : vector<1x16x24xbf16> to vector<16x24xbf16>
    %cst_28 = arith.constant dense<0.000000e+00> : vector<32x24xf32>
    %46 = tpu.matmul %43, %45, %cst_28 {dimension_numbers = #tpu.dot_dimension_numbers<[1], [0], [0], [1], [0, 0, 1, 1], [], []>} : vector<32x16xbf16>, vector<16x24xbf16>, vector<32x24xf32> -> vector<32x24xf32>
    %47 = arith.addf %41, %46 : vector<32x24xf32>
    %48 = vector.extract_strided_slice %4 {offsets = [2, 1, 0], sizes = [4, 8, 16], strides = [1, 1, 1]} : vector<6x10x16xbf16> to vector<4x8x16xbf16>
    %49 = vector.shape_cast %48 : vector<4x8x16xbf16> to vector<32x16xbf16>
    %c7 = arith.constant 7 : index
    %c0_29 = arith.constant 0 : index
    %c0_30 = arith.constant 0 : index
    %50 = vector.load %arg4[%c7, %c0_29, %c0_30] : memref<9x16x24xbf16, #tpu.memory_space<vmem>>, vector<1x16x24xbf16>
    %51 = vector.shape_cast %50 : vector<1x16x24xbf16> to vector<16x24xbf16>
    %cst_31 = arith.constant dense<0.000000e+00> : vector<32x24xf32>
    %52 = tpu.matmul %49, %51, %cst_31 {dimension_numbers = #tpu.dot_dimension_numbers<[1], [0], [0], [1], [0, 0, 1, 1], [], []>} : vector<32x16xbf16>, vector<16x24xbf16>, vector<32x24xf32> -> vector<32x24xf32>
    %53 = arith.addf %47, %52 : vector<32x24xf32>
    %54 = vector.extract_strided_slice %4 {offsets = [2, 2, 0], sizes = [4, 8, 16], strides = [1, 1, 1]} : vector<6x10x16xbf16> to vector<4x8x16xbf16>
    %55 = vector.shape_cast %54 : vector<4x8x16xbf16> to vector<32x16xbf16>
    %c8 = arith.constant 8 : index
    %c0_32 = arith.constant 0 : index
    %c0_33 = arith.constant 0 : index
    %56 = vector.load %arg4[%c8, %c0_32, %c0_33] : memref<9x16x24xbf16, #tpu.memory_space<vmem>>, vector<1x16x24xbf16>
    %57 = vector.shape_cast %56 : vector<1x16x24xbf16> to vector<16x24xbf16>
    %cst_34 = arith.constant dense<0.000000e+00> : vector<32x24xf32>
    %58 = tpu.matmul %55, %57, %cst_34 {dimension_numbers = #tpu.dot_dimension_numbers<[1], [0], [0], [1], [0, 0, 1, 1], [], []>} : vector<32x16xbf16>, vector<16x24xbf16>, vector<32x24xf32> -> vector<32x24xf32>
    %59 = arith.addf %53, %58 : vector<32x24xf32>
    %c0_35 = arith.constant 0 : index
    %c0_36 = arith.constant 0 : index
    %60 = vector.load %arg5[%c0_35, %c0_36] : memref<1x24xf32, #tpu.memory_space<vmem>>, vector<1x24xf32>
    %61 = vector.broadcast %60 : vector<1x24xf32> to vector<32x24xf32>
    %62 = arith.addf %59, %61 : vector<32x24xf32>
    %cst_37 = arith.constant 0.000000e+00 : f32
    %63 = vector.broadcast %cst_37 : f32 to vector<32x24xf32>
    %64 = arith.maximumf %62, %63 : vector<32x24xf32>
    %65 = vector.shape_cast %64 : vector<32x24xf32> to vector<4x8x24xf32>
    %c0_38 = arith.constant 0 : index
    %c0_39 = arith.constant 0 : index
    %c0_40 = arith.constant 0 : index
    %c0_41 = arith.constant 0 : index
    %66 = vector.load %arg6[%c0_38, %c0_39, %c0_40, %c0_41] : memref<1x4x8x24xf32, #tpu.memory_space<vmem>>, vector<1x4x8x24xf32>
    %67 = vector.shape_cast %66 : vector<1x4x8x24xf32> to vector<4x8x24xf32>
    %68 = vector.shape_cast %65 : vector<4x8x24xf32> to vector<1x4x8x24xf32>
    tpu.vector_store %arg6[%c0_38, %c0_39, %c0_40, %c0_41], %68 {strides = array<i32>} : memref<1x4x8x24xf32, #tpu.memory_space<vmem>>, vector<1x4x8x24xf32>,
    return
  }
  func.func @transform_0(%arg0: i32, %arg1: i32) -> (i32, i32, i32, i32) {
    %c0_i32 = arith.constant 0 : i32
    %c0_i32_0 = arith.constant 0 : i32
    %c0_i32_1 = arith.constant 0 : i32
    return %arg0, %arg1, %c0_i32, %c0_i32_0 : i32, i32, i32, i32
  }
  func.func @transform_1(%arg0: i32, %arg1: i32) -> (i32, i32, i32, i32) {
    %c3_i32 = arith.constant 3 : i32
    %0 = arith.muli %arg0, %c3_i32 : i32
    %1 = arith.addi %0, %arg1 : i32
    %c0_i32 = arith.constant 0 : i32
    %c0_i32_0 = arith.constant 0 : i32
    %c0_i32_1 = arith.constant 0 : i32
    %c0_i32_2 = arith.constant 0 : i32
    return %1, %c0_i32, %c0_i32_0, %c0_i32_1 : i32, i32, i32, i32
  }
  func.func @transform_2(%arg0: i32, %arg1: i32) -> (i32, i32, i32) {
    %c0_i32 = arith.constant 0 : i32
    %c0_i32_0 = arith.constant 0 : i32
    %c0_i32_1 = arith.constant 0 : i32
    %c0_i32_2 = arith.constant 0 : i32
    return %c0_i32, %c0_i32_0, %c0_i32_1 : i32, i32, i32
  }
  func.func @transform_3(%arg0: i32, %arg1: i32) -> (i32, i32) {
    %c0_i32 = arith.constant 0 : i32
    %c0_i32_0 = arith.constant 0 : i32
    %c0_i32_1 = arith.constant 0 : i32
    return %c0_i32, %c0_i32_0 : i32, i32
  }
  func.func @transform_4(%arg0: i32, %arg1: i32) -> (i32, i32, i32, i32) {
    %c0_i32 = arith.constant 0 : i32
    %c0_i32_0 = arith.constant 0 : i32
    %c0_i32_1 = arith.constant 0 : i32
    return %arg0, %arg1, %c0_i32, %c0_i32_0 : i32, i32, i32, i32
  }
}

</mosaic_0001>

<bundles_post_ra>
// kernel: fused_conv.1
= control target key start
LH: loop header
LB: loop body
LE: loop exit
PB: predicated region body
PF: predicated region fallthrough
CT: control target
= control target key end

     0   :  { %9 = vsyncpa [#allocation3], 0  ;;  %s1492_s0 = inlined_call_operand.vmem [shape: bf16[2,12,10,16], index: 0, kind: input, shape index: {}]   ;;  %s1493_s1 = inlined_call_operand.vmem [shape: bf16[6,2,10,16], index: 1, kind: input, shape index: {}]   ;;  %s1494_s2 = inlined_call_operand.vmem [shape: bf16[9,16,24], index: 2, kind: input, shape index: {}]   ;;  %s1495_s3 = inlined_call_operand.vmem [shape: f32[1,24], index: 3, kind: input, shape index: {}]   ;;  %s1496_s4 = inlined_call_operand.hbm [shape: f32[2,12,8,24], index: 4, kind: output, shape index: {}]  }
   0x1   :  { %11 = vsyncpa [#allocation3 + $0x1], 0  ;;  %s1195_s15 = smov 0   ;;  %s1197_s16 = smov 0  }
   0x2   :  { %s1199_s17 = smov 0   ;;  %s1201_s18 = smov 0  }
   0x3   :  { %s1203_s19 = smov 0   ;;  %s1205_s20 = smov 0  }
   0x4   :  { %s1207_s21 = smov 0   ;;  %s1209_s22 = smov 0  }
   0x5 LB: > { %s893_s23 = sadd.s32 4294967295, %s1166_s22   ;;  %s894_s24 = sadd.s32 4294967294, %s1166_s22   ;;  %s1166_s22 = sphi %s1209_s22, %s17_s22   ;;  %s1162_s21 = sphi %s1207_s21, %s1512_s21   ;;  %s1158_s20 = sphi %s1205_s20, %s1511_s20   ;;  %s1154_s19 = sphi %s1203_s19, %s1510_s19   ;;  %s1150_s18 = sphi %s1201_s18, %s1509_s18   ;;  %s1146_s17 = sphi %s1199_s17, %s1508_s17   ;;  %s1142_s16 = sphi %s1197_s16, %s1507_s16   ;;  %s1138_s15 = sphi %s1195_s15, %s1506_s15  }
   0x6   : > { %s26_s25 = sadd.s32 1, %s1158_s20  ;;  %s29_s26 = sadd.s32 1, %s1162_s21 }
   0x7   : > { %p27_p0 = scmp.ge.s32.totalorder %s26_s25, 3  ;;  %p148_p1 = scmp.ne.s32.totalorder %s1146_s17, %s1142_s16 }
   0x8   : > { %p149_p2 = scmp.eq.s32.totalorder %s893_s23, 5  ;;  %p154_p5 = scmp.ne.s32.totalorder %s1142_s16, %s1138_s15 }
   0x9   : > { %s1514_s25 = smov (%p27_p0, %s26_s25), 0  ;;  %s1516_s26 = smov (!%p27_p0, %s29_s26), %s1162_s21 }
   0xa   : > { %s134_s27 = ssub.s32 %s1158_s20, %s1514_s25  ;;  %p1246_p3 = por %p149_p2, %p148_p1 }
   0xb   : > { %p31_p4 = scmp.ge.s32.totalorder %s1516_s26, 2  ;;  %p155_p6 = scmp.eq.s32.totalorder %s894_s24, 5 }
   0xc   : > { %p897_p7 = scmp.ge.s32.totalorder %s1166_s22, 1  ;;  %p205_p9 = scmp.lt.s32.totalorder %s1166_s22, 7 }
   0xd   : > { %s1518_s26 = smov (%p31_p4, %s1516_s26), 0  ;;  %p1255_p8 = por %p155_p6, %p154_p5 }
   0xe   : > { %1499 = sst [smem:[#allocation5_spill]] %s1518_s26  ;;  %s133_s30 = ssub.s32 %s1162_s21, %s1518_s26 }
   0xf   : > { %s138_s5 = sadd.s32 1, %s1146_s17  ;;  %s135_s6 = sor.u32 %s134_s27, %s133_s30 }
  0x10   : > { %p206_p10 = pnand %p897_p7, %p205_p9  ;;  %p136_p11 = scmp.eq.s32.totalorder %s135_s6, 0 }
  0x11   : > { %s1270_s10 = sshll.u32 (!%p206_p10), %s1150_s18, 2  ;;  %p244_p12 = scmp.lt.s32.totalorder (!%p206_p10), %s1154_s19, 1 }
  0x12   : > { %s1264_s7 = scalar_select %p136_p11, %s1146_s17, %s138_s5  }
  0x13   : > { %209 = sbr.rel (%p206_p10) target bundleno = 263 (0x107), region = 36  ;;  %p246_p13 = scmp.lt.s32.totalorder (!%p206_p10), %s1270_s10, 11 }
  0x14   : > { %s254_s23 = smul.u32 (!%p206_p10), 3, %s1154_s19 }
  0x15   : > { %s997_s8 = smul.u32 (!%p206_p10), 12, %s1154_s19 }
  0x16   : > { %s1296_s5 = sadd.s32 (!%p206_p10), %s1150_s18, %s254_s23  ;;  %s240_s23 = sand.u32 (!%p206_p10), 1, %s1142_s16  }
  0x17   : > { %p256_p0 = scmp.lt.s32.totalorder (!%p206_p10), %s1296_s5, 5 }
  0x18   : > { %v987_v0 = vld [vmem:[%s1494_s2 + $0x8] sm:$0xff]  ;;  %v986_v1 = vld [vmem:[%s1494_s2] sm:$0xff]  ;;  %v988_v2 = vld [vmem:[%s1494_s2 + $0x10] sm:$0xff]  ;;  %s245_s27 = scalar_select %p244_p12, %s1154_s19, 1  ;;  %vm279_vm0 = vsmask.f32 3328 }
  0x19   : > { %v989_v3 = vld [vmem:[%s1494_s2 + $0x18] sm:$0xff]  ;;  %367 = vmatpush.bf16.msra.mxu0 %v987_v0  ;;  %995 = vmatpush.bf16.msra.mxu1 %v987_v0  ;;  %v990_v4 = vld [vmem:[%s1494_s2 + $0x20] sm:$0xff]  ;;  %v992_v5 = vld [vmem:[%s1494_s2 + $0x30] sm:$0xff]  ;;  %s247_s9 = scalar_select %p246_p13, %s1270_s10, 11  ;;  %vm280_vm1 = vsmask.f32 7440 }
  0x1a   : > { %471 = vmatpush.bf16.msra.mxu2 %v988_v2  ;;  %v993_v6 = vld [vmem:[%s1494_s2 + $0x38] sm:$0xff]  ;;  %s996_s13 = smul.u32 24, %s245_s27  ;;  %513 = vmatpush.bf16.msra.mxu3 %v989_v3  ;;  %vm424_vm2 = vcmask 1042432   ;;  %vm425_vm3 = vcmask 1046532   ;;  %vm1326_vm4 = vmor %vm279_vm0, %vm280_vm1  ;;  %s1520_s5 = smov (!%p256_p0, %s1296_s5), 5  ;;  %vm353_vm6 = vcmask 130048  }
  0x1b   : > { %s900_s14 = sshll.u32 %s247_s9, 1  ;;  %vm1338_vm5 = vmor %vm424_vm2, %vm425_vm3  ;;  %s985_s18 = sshll.u32 %s1520_s5, 4  ;;  %v994_v63 = vld [vmem:[%s1494_s2 + $0x40] sm:$0xff]  ;;  %vm773_vm7 = vcmask 195584  }
  0x1c   : > { %s250_s24 = sadd.s32 %s996_s13, %s900_s14  ;;  %s1371_s12 = scalar_lea.vmem %s1493_s1, %s985_s18 }
  0x1d   : > { %408 = vmatpush.bf16.msrb.mxu1 %v986_v1  ;;  %568 = vmatpush.bf16.msrb.mxu0 %v990_v4  ;;  %s901_s30 = sshll.u32 %s250_s24, 2  ;;  %s898_s5 = sshll.u32 %s240_s23, 5 }
  0x1e   : > { %652 = vmatpush.bf16.msrb.mxu2 %v992_v5  ;;  %703 = vmatpush.bf16.msrb.mxu3 %v993_v6  ;;  %s252_s26 = scalar_lea.vmem %s1492_s0, %s901_s30  ;;  %s1436_s6 = scalar_lea.vmem [#allocation2], %s898_s5 }
  0x1f   : > { %v1302_v7 = vld [vmem:[%s252_s26] sm:$0xf]  ;;  %v266_v8 = vld [vmem:[%s252_s26 + $0x4] sm:$0x1]  ;;  %v1304_v9 = vld [vmem:[%s252_s26 + $0x8] sm:$0xf]  ;;  %s790_s18 = sadd.s32 %s997_s8, %s1270_s10 }
  0x20   : > { %v268_v10 = vld [vmem:[%s252_s26 + $0xc] sm:$0x1]  ;;  %v283_v11 = vshrl.u32 %v1302_v7, 16  ;;  %v286_v12 = vshll.u32 %v1302_v7, 16  ;;  %v292_v13 = vshll.u32 %v266_v8, 16  ;;  %v297_v14 = vshrl.u32 %v1304_v9, 16 }
  0x21   : > { %v300_v15 = vshll.u32 %v1304_v9, 16  ;;  %v306_v16 = vshll.u32 %v268_v10, 16  ;;  %v1310_v17 = vld [vmem:[%s252_s26 + $0x10] sm:$0xf]  ;;  %v1312_v18 = vld [vmem:[%s252_s26 + $0x14] sm:$0x1]  ;;  %v384_v19 = vunpack.c.l.b16 %v1304_v9 }
  0x22   : > { %v285_v20 = vrot.slane %v283_v11, 4  ;;  %v288_v21 = vrot.slane %v286_v12, 5  ;;  %v294_v22 = vrot.slane %v292_v13, 5  ;;  %v299_v23 = vrot.slane %v297_v14, 4  ;;  %v1315_v24 = vld [vmem:[%s252_s26 + $0x18] sm:$0xf] }
  0x23   : > { %v302_v25 = vrot.slane %v300_v15, 5  ;;  %v308_v26 = vrot.slane %v306_v16, 5  ;;  %v1317_v27 = vld [vmem:[%s252_s26 + $0x1c] sm:$0x1]  ;;  %v311_v28 = vshrl.u32 %v1310_v17, 16  ;;  %v314_v29 = vshll.u32 %v1310_v17, 16 }
  0x24   : > { %v289_v30 = vor.u32 %v288_v21, %v285_v20  ;;  %v320_v31 = vshll.u32 %v1312_v18, 16  ;;  %v325_v32 = vshrl.u32 %v1315_v24, 16  ;;  %v328_v33 = vshll.u32 %v1315_v24, 16  ;;  %v1382_v11 = vld [vmem:[%s1371_s12] sm:$0xf]  ;;  %s982_s26 = sshll.u32 %s790_s18, 3 }
  0x25   : > { %v303_v35 = vor.u32 %v302_v25, %v299_v23  ;;  %v313_v36 = vrot.slane %v311_v28, 4  ;;  %v316_v37 = vrot.slane %v314_v29, 5  ;;  %v334_v38 = vshll.u32 %v1317_v27, 16  ;;  %v274_v29 = vld [vmem:[%s1371_s12 + $0x4] sm:$0x1]  ;;  %s792_s9 = scalar_lea.hbm %s1496_s4, %s982_s26  ;;  %s793_s10 = sshll.u32 %s1436_s6, 4  ;;  %s794_s10 = int_to_ptr.vmem [resolvable:$true] %s793_s10 }
  0x26   : > { %v290_v39 = vrot.slane %v289_v30, 4  ;;  %v322_v40 = vrot.slane %v320_v31, 5  ;;  %v327_v41 = vrot.slane %v325_v32, 4  ;;  %v330_v42 = vrot.slane %v328_v33, 5  ;;  %s795_s11 = sshll.u32 %s792_s9, 4  ;;  %s1092_s5 = scalar_lea.hbm %s1496_s4, 192  ;;  %s796_s11 = int_to_ptr.hbm [resolvable:$true] %s795_s11 }
  0x27   : > { %v304_v43 = vrot.slane %v303_v35, 4  ;;  %v317_v44 = vor.u32 %v316_v37, %v313_v36  ;;  %v336_v45 = vrot.slane %v334_v38, 5  ;;  %v918_v47 = vrot.slane %v1302_v7, 9  ;;  %s1086_s13 = sshra.s32 %s796_s11, 4  ;;  %s1087_s13 = int_to_ptr.hbm [resolvable:$true] %s1086_s13 }
  0x28   : > { %v295_v48 = vsel %vm1326_vm4, %v290_v39, %v294_v22  ;;  %v331_v49 = vor.u32 %v330_v42, %v327_v41  ;;  %v429_v50 = vrot.slane %v266_v8, 5  ;;  %v919_v51 = vrot.slane %v1304_v9, 9  ;;  %v991_v8 = vld [vmem:[%s1494_s2 + $0x28] sm:$0xff]  ;;  %s1088_s14 = scalar_lea.hbm %s1087_s13, 32  ;;  %p1093_p5 = scmp.lt.s32.totalorder %s1087_s13, %s1496_s4 }
  0x29   : > { %v309_v52 = vsel %vm1326_vm4, %v304_v43, %v308_v26  ;;  %v341_v53 = vunpack.c.l.b16 %v295_v48  ;;  %v318_v54 = vrot.slane %v317_v44, 4  ;;  %v433_v55 = vrot.slane %v268_v10, 5  ;;  %p1089_p1 = scmp.ne.s32.totalorder %s1087_s13, %s1088_s14  ;;  %p1094_p6 = scmp.lt.s32.totalorder %s1092_s5, %s1088_s14 }
  0x2a   : > { %v342_v56 = vunpack.c.l.b16 %v309_v52  ;;  %v332_v57 = vrot.slane %v331_v49, 4  ;;  %v430_v58 = vsel %vm1338_vm5, %v918_v47, %v429_v50  ;;  %v385_v59 = vunpack.c.l.b16 %v1310_v17 }
  0x2b   : > { %v323_v60 = vsel %vm1326_vm4, %v318_v54, %v322_v40  ;;  %v1356_v61 = vsel %vm1338_vm5, %v919_v51, %v433_v55  ;;  %v446_v62 = vunpack.c.l.b16 %v430_v58  ;;  %v920_v12 = vrot.slane %v1310_v17, 9  ;;  %p1090_p2 = pnand %p1089_p1, %p1246_p3  ;;  %p1095_p7 = por %p1094_p6, %p1093_p5 }
  0x2c   : > { %v345_v0 = vpack.c.b16 %v342_v56, %v341_v53  ;;  %v337_v1 = vsel %vm1326_vm4, %v332_v57, %v336_v45  ;;  %v343_v2 = vunpack.c.l.b16 %v323_v60  ;;  %v447_v3 = vunpack.c.l.b16 %v1356_v61 }
  0x2d   : > { %v344_v4 = vunpack.c.l.b16 %v337_v1  ;;  %v492_v5 = vpack.c.b16 %v385_v59, %v384_v19  ;;  %v437_v13 = vrot.slane %v1312_v18, 5  ;;  %v921_v14 = vrot.slane %v1315_v24, 9  ;;  %p1091_p4 = pneg %p1090_p2 }
  0x2e   : > { %910 = vmatmul.msk.bf16.vlgmr.msra.gmra.mxu0 %vm353_vm6, %v345_v0  ;;  %v450_v6 = vpack.c.b16 %v447_v3, %v446_v62  ;;  %v441_v15 = vrot.slane %v1317_v27, 5  ;;  %v530_v16 = vshrl.u32 %v1382_v11, 16  ;;  %v533_v20 = vshll.u32 %v1382_v11, 16 }
  0x2f   : > { %v346_v10 = vpack.c.b16 %v344_v4, %v343_v2  ;;  %936 = vmatmul.msk.bf16.vlgmr.msra.gmra.mxu3 %vm353_vm6, %v492_v5  ;;  %745 = vmatpush.bf16.msra.mxu0 %v994_v63  ;;  %v438_v21 = vsel %vm1338_vm5, %v920_v12, %v437_v13  ;;  %v386_v23 = vunpack.c.l.b16 %v1315_v24  ;;  %v491_v25 = vunpack.c.l.b16 %v1382_v11  ;;  %p1096_p9 = pnand %p1095_p7, %p1091_p4 }
  0x30   : > { %928 = vmatmul.msk.bf16.vlgmr.msra.gmra.mxu2 %vm353_vm6, %v450_v6  ;;  %v442_v22 = vsel %vm1338_vm5, %v921_v14, %v441_v15  ;;  %v532_v18 = vrot.slane %v530_v16, 4  ;;  %v535_v26 = vrot.slane %v533_v20, 5  ;;  %v448_v28 = vunpack.c.l.b16 %v438_v21 }
  0x31   : > { %911 = vmatmul.msk.bf16.vlgmr.msra.gmra.mxu1 %vm353_vm6, %v346_v10  ;;  %v449_v27 = vunpack.c.l.b16 %v442_v22  ;;  %v383_v30 = vunpack.c.l.b16 %v1302_v7  ;;  %v547_v31 = vpack.c.b16 %v343_v2, %v342_v56  ;;  %v493_v32 = vpack.c.b16 %v491_v25, %v386_v23  ;;  %v275_v7 = vld [vmem:[%s1371_s12 + $0x8] sm:$0xf] }
  0x32   : > { %614 = vmatpush.bf16.msra.mxu1 %v991_v8  ;;  %v536_v33 = vor.u32 %v535_v26, %v532_v18  ;;  %v539_v35 = vshll.u32 %v274_v29, 16  ;;  %v669_v40 = vshrl.u32 %v275_v7, 16  ;;  %v672_v41 = vshll.u32 %v275_v7, 16 }
  0x33   : > { %v451_v36 = vpack.c.b16 %v449_v27, %v448_v28  ;;  %v387_v37 = vpack.c.b16 %v384_v19, %v383_v30  ;;  %v276_v19 = vld [vmem:[%s1371_s12 + $0xc] sm:$0x1]  ;;  %v388_v48 = vpack.c.b16 %v386_v23, %v385_v59  ;;  %v634_v53 = vunpack.c.l.b16 %v275_v7  ;;  %s779_s12 = scalar_lea.sflag [#allocation3], %s240_s23 }
  0x34   : > { %v537_v24 = vrot.slane %v536_v33, 4  ;;  %v541_v38 = vrot.slane %v539_v35, 5  ;;  %v671_v43 = vrot.slane %v669_v40, 4  ;;  %v674_v9 = vrot.slane %v672_v41, 5 }
  0x35   : > { %v678_v47 = vshll.u32 %v276_v19, 16  ;;  %v635_v55 = vpack.c.b16 %v634_v53, %v491_v25  ;;  %v593_v17 = vpack.c.b16 %v448_v28, %v447_v3  ;;  %v946_v56 = vrot.slane %v1382_v11, 9 }
  0x36   : > { %v542_v39 = vsel %vm1326_vm4, %v537_v24, %v541_v38  ;;  %v675_v45 = vor.u32 %v674_v9, %v671_v43  ;;  %v587_v57 = vrot.slane %v274_v29, 5  ;;  %v971_v58 = vrot.slane %v275_v7, 9 }
  0x37   : > { %v546_v42 = vunpack.c.l.b16 %v542_v39  ;;  %v680_v50 = vrot.slane %v678_v47, 5  ;;  %v722_v59 = vrot.slane %v276_v19, 5  ;;  %v1071_v39 = vld [vmem:[%s1495_s3] ss:$0 sm:$0xff] }
  0x38   : > { %v676_v49 = vrot.slane %v675_v45, 4  ;;  %v588_v34 = vsel %vm1338_vm5, %v946_v56, %v587_v57 }
  0x39   : > { %v548_v44 = vpack.c.b16 %v546_v42, %v344_v4  ;;  %v723_v60 = vsel %vm1338_vm5, %v971_v58, %v722_v59  ;;  %v592_v61 = vunpack.c.l.b16 %v588_v34 }
  0x3a   : > { %v681_v51 = vsel %vm1326_vm4, %v676_v49, %v680_v50  ;;  %v727_v62 = vunpack.c.l.b16 %v723_v60 }
  0x3b   : > { %v685_v52 = vunpack.c.l.b16 %v681_v51  ;;  %v594_v0 = vpack.c.b16 %v592_v61, %v449_v27 }
  0x3c   : > { %v728_v63 = vpack.c.b16 %v727_v62, %v592_v61 }
  0x3d   : > { %v686_v54 = vpack.c.b16 %v685_v52, %v546_v42 }
  0x3e   : > { %944 = vmatmul.msk.bf16.vlgmr.msrb.gmra.mxu0 %vm353_vm6, %v547_v31 }
  0x3f   : > { %937 = vmatmul.msk.bf16.gmra.mxu3 %vm353_vm6, %v493_v32 }
  0x40   : > { %929 = vmatmul.msk.bf16.gmra.mxu2 %vm353_vm6, %v451_v36 }
  0x41   : > { %916 = vmatmul.msk.bf16.vlgmr.msrb.gmra.mxu1 %vm353_vm6, %v387_v37 }
  0x4e   : > { %945 = vmatmul.msk.bf16.gmra.mxu0 %vm353_vm6, %v548_v44 }
  0x4f   : > { %969 = vmatmul.msk.bf16.vlgmr.msrb.gmra.mxu3 %vm353_vm6, %v346_v10 }
  0x50   : > { %961 = vmatmul.msk.bf16.vlgmr.msrb.gmra.mxu2 %vm353_vm6, %v388_v48 }
  0x51   : > { %917 = vmatmul.msk.bf16.gmra.mxu1 %vm353_vm6, %v388_v48 }
  0x5e   : > { %978 = vmatmul.msk.bf16.vlgmr.msra.gmra.mxu0 %vm353_vm6, %v451_v36 }
  0x5f   : > { %970 = vmatmul.msk.bf16.gmra.mxu3 %vm353_vm6, %v686_v54 }
  0x60   : > { %962 = vmatmul.msk.bf16.gmra.mxu2 %vm353_vm6, %v635_v55 }
  0x61   : > { %953 = vmatmul.msk.bf16.vlgmr.msra.gmra.mxu1 %vm353_vm6, %v593_v17 }
  0x6e   : > { %979 = vmatmul.msk.bf16.gmra.mxu0 %vm353_vm6, %v728_v63 }
  0x71   : > { %954 = vmatmul.msk.bf16.gmra.mxu1 %vm353_vm6, %v594_v0 }
  0xab   : > { %v369_v1 = vpop.f32.mrf.mxu0 }
  0xae   : > { %v374_v2 = vpop.f32.mrf.mxu1 }
  0xb2   : > { %v515_v5 = vpop.f32.mrf.mxu3 }
  0xb3   : > { %v371_v3 = vpop.f32.mrf.mxu0  ;;  %v473_v4 = vpop.f32.mrf.mxu2 }
  0xb6   : > { %v376_v6 = vpop.f32.mrf.mxu1 }
  0xba   : > { %v517_v12 = vpop.f32.mrf.mxu3 }
  0xbb   : > { %v570_v8 = vpop.f32.mrf.mxu0  ;;  %v475_v10 = vpop.f32.mrf.mxu2 }
  0xbe   : > { %v410_v11 = vpop.f32.mrf.mxu1 }
  0xbf   : > { %v411_v22 = vadd.f32 %v410_v11, %v369_v1 }
  0xc1   : > { %v483_v18 = vadd.f32 %v473_v4, %v411_v22 }
  0xc2   : > { %v520_v15 = vpop.f32.mrf.mxu3 }
  0xc3   : > { %v572_v46 = vpop.f32.mrf.mxu0  ;;  %v478_v14 = vpop.f32.mrf.mxu2  ;;  %v525_v28 = vadd.f32 %v515_v5, %v483_v18 }
  0xc5   : > { %v580_v31 = vadd.f32 %v570_v8, %v525_v28 }
  0xc6   : > { %v412_v13 = vpop.f32.mrf.mxu1 }
  0xc7   : > { %v413_v27 = vadd.f32 %v412_v13, %v371_v3 }
  0xc9   : > { %v484_v32 = vadd.f32 %v475_v10, %v413_v27 }
  0xca   : > { %v522_v23 = vpop.f32.mrf.mxu3 }
  0xcb   : > { %v575_v16 = vpop.f32.mrf.mxu0  ;;  %v480_v21 = vpop.f32.mrf.mxu2  ;;  %v526_v37 = vadd.f32 %v517_v12, %v484_v32 }
  0xcd   : > { %v581_v41 = vadd.f32 %v572_v46, %v526_v37 }
  0xce   : > { %v415_v20 = vpop.f32.mrf.mxu1 }
  0xcf   : > { %v416_v24 = vadd.f32 %v415_v20, %v374_v2 }
  0xd1   : > { %v485_v42 = vadd.f32 %v478_v14, %v416_v24 }
  0xd2   : > { %v705_v30 = vpop.f32.mrf.mxu3 }
  0xd3   : > { %v577_v25 = vpop.f32.mrf.mxu0  ;;  %v654_v29 = vpop.f32.mrf.mxu2  ;;  %v527_v48 = vadd.f32 %v520_v15, %v485_v42 }
  0xd5   : > { %v582_v53 = vadd.f32 %v575_v16, %v527_v48 }
  0xd6   : > { %v417_v26 = vpop.f32.mrf.mxu1 }
  0xd7   : > { %v418_v49 = vadd.f32 %v417_v26, %v376_v6 }
  0xd9   : > { %v486_v54 = vadd.f32 %v480_v21, %v418_v49 }
  0xda   : > { %v707_v9 = vpop.f32.mrf.mxu3 }
  0xdb   : > { %v747_v35 = vpop.f32.mrf.mxu0  ;;  %v656_v40 = vpop.f32.mrf.mxu2  ;;  %v528_v34 = vadd.f32 %v522_v23, %v486_v54 }
  0xdd   : > { %v583_v0 = vadd.f32 %v577_v25, %v528_v34 }
  0xde   : > { %v616_v33 = vpop.f32.mrf.mxu1 }
  0xdf   : > { %v626_v36 = vadd.f32 %v616_v33, %v580_v31 }
  0xe1   : > { %v664_v38 = vadd.f32 %v654_v29, %v626_v36 }
  0xe2   : > { %v710_v59 = vpop.f32.mrf.mxu3 }
  0xe3   : > { %v715_v7 = vadd.f32 %v705_v30, %v664_v38  ;;  %v749_v47 = vpop.f32.mrf.mxu0  ;;  %v659_v17 = vpop.f32.mrf.mxu2 }
  0xe5   : > { %v757_v43 = vadd.f32 %v747_v35, %v715_v7 }
  0xe6   : > { %v618_v19 = vpop.f32.mrf.mxu1 }
  0xe7   : > { %v765_v44 = vadd.f32 %v1071_v39, %v757_v43  ;;  %v627_v45 = vadd.f32 %v618_v19, %v581_v41 }
  0xe9   : > { %v769_v50 = vmax.f32 %v765_v44, 0.0  ;;  %v665_v51 = vadd.f32 %v656_v40, %v627_v45 }
  0xea   : > { %v712_v10 = vpop.f32.mrf.mxu3 }
  0xeb   : > { %774 = vst.msk [vmem:[%s1436_s6] sm:$0xff] %vm773_vm7, %v769_v50  ;;  %v716_v52 = vadd.f32 %v707_v9, %v665_v51  ;;  %v752_v62 = vpop.f32.mrf.mxu0  ;;  %v661_v5 = vpop.f32.mrf.mxu2 }
  0xed   : > { %v758_v55 = vadd.f32 %v749_v47, %v716_v52 }
  0xee   : > { %v621_v56 = vpop.f32.mrf.mxu1 }
  0xef   : > { %v766_v57 = vadd.f32 %v1071_v39, %v758_v55  ;;  %v628_v58 = vadd.f32 %v621_v56, %v582_v53 }
  0xf1   : > { %v770_v60 = vmax.f32 %v766_v57, 0.0  ;;  %v666_v61 = vadd.f32 %v659_v17, %v628_v58 }
  0xf3   : > { %775 = vst.msk [vmem:[%s1436_s6 + $0x8] sm:$0xff] %vm773_vm7, %v770_v60  ;;  %v717_v63 = vadd.f32 %v710_v59, %v666_v61  ;;  %v754_v12 = vpop.f32.mrf.mxu0 }
  0xf5   : > { %v759_v1 = vadd.f32 %v752_v62, %v717_v63 }
  0xf6   : > { %v623_v2 = vpop.f32.mrf.mxu1 }
  0xf7   : > { %v767_v3 = vadd.f32 %v1071_v39, %v759_v1  ;;  %v629_v4 = vadd.f32 %v623_v2, %v583_v0 }
  0xf9   : > { %v771_v6 = vmax.f32 %v767_v3, 0.0  ;;  %v667_v8 = vadd.f32 %v661_v5, %v629_v4 }
  0xfb   : > { %776 = vst.msk [vmem:[%s1436_s6 + $0x10] sm:$0xff] %vm773_vm7, %v771_v6  ;;  %v718_v11 = vadd.f32 %v712_v10, %v667_v8 }
  0xfd   : > { %v760_v46 = vadd.f32 %v754_v12, %v718_v11 }
  0xff   : > { %v768_v13 = vadd.f32 %v1071_v39, %v760_v46 }
 0x101   : > { %v772_v14 = vmax.f32 %v768_v13, 0.0 }
 0x103   : > { %777 = vst.msk [vmem:[%s1436_s6 + $0x18] sm:$0xff] %vm773_vm7, %v772_v14 }
 0x104   : > { %1099 = shalt.err (!%p1096_p9)
}
 0x105   : > { %s1168_s23 = smov 128   ;;  %s1169_s6 = smov 8  }
 0x106   : > { %998 = dma.vmem_to_hbm [thread:$0]  (%p1246_p3), %s794_s10, 512, %s796_s11, %s779_s12, %s1168_s23, %s1168_s23, %s1169_s6  }
 0x107 PF: > { %p1004_p10 = scmp.ge.s32.totalorder %s1166_s22, 2  ;;  %s810_s26 = sand.u32 1, %s1138_s15  }
 0x108   : > { %s811_s19 = scalar_lea.sflag [#allocation3], %s810_s26 }
 0x109   : > { %p1001_p11 = pnand %p1004_p10, %p1255_p8 }
 0x10b   : > { %p1002_p12 = pneg %p1001_p11 }
 0x10d   : > { %1133 = dma.done.wait (%p1002_p12), %s811_s19, 512  }
 0x10e   : > { %1135 = vsyncadd (%p1002_p12), %s811_s19, 4294966784  ;;  %s17_s22 = sadd.s32 1, %s1166_s22   ;;  %s1505_s28 = sld [smem:[#allocation5_spill]] }
 0x10f   : > { %p14_p13 = scmp.ge.s32.totalorder %s17_s22, 8   ;;  %s1506_s15 = smov %s1142_s16 }
 0x110   : > { %s1507_s16 = smov %s1146_s17  ;;  %s1508_s17 = smov %s1264_s7 }
 0x111   : > { %s1509_s18 = smov %s1158_s20  ;;  %s1510_s19 = smov %s1162_s21 }
 0x112   : > { %s1511_s20 = smov %s1514_s25  ;;  %16 = sbr.rel (!%p14_p13) target bundleno = 5 (0x5), region = 82 }
 0x114   : > { %s1512_s21 = smov %s1505_s28 }
 0x117   :  { %817 = vsyncpa [#allocation3], 1 }
 0x118   :  { %819 = vsyncpa [#allocation3 + $0x1], 1 }

</bundles_post_ra>
